<compile_context>
chip_gen: v5e
topology: v5e:2x2
jax: 0.10.0
libtpu: 0.0.40
codegen_flags: <defaults>
</compile_context>

<pallas_src>
import jax
import jax.numpy as jnp
from jax import lax
from jax.experimental import pallas as pl
from jax.experimental.pallas import tpu as pltpu


def _center_loss_kernel(x_ref, lab_ref, c_ref, d_ref):
    """One grid step = one batch tile.

    x_ref   : (block_b, D) VMEM tile of features
    lab_ref : (block_b, 1) int32 VMEM tile of labels
    c_ref   : (C, D)       VMEM, full centers table (resident across the grid)
    d_ref   : (block_b, 1) f32 output tile of clamped per-row squared distances
    """
    num_classes = c_ref.shape[0]
    block_b = x_ref.shape[0]

    x = x_ref[...].astype(jnp.float32)                       # (bb, D)
    labels = lab_ref[...]                                     # (bb, 1) int32
    centers = c_ref[...].astype(jnp.float32)                  # (C, D)

    # Vectorized gather of centers[labels] on the MXU via a one-hot matmul.
    classes = lax.broadcasted_iota(jnp.int32, (block_b, num_classes), 1)
    onehot = (labels == classes).astype(jnp.float32)          # (bb, C)
    gathered = jnp.dot(onehot, centers,
                       preferred_element_type=jnp.float32)    # (bb, D)

    diff = x - gathered
    d = jnp.sum(diff * diff, axis=1, keepdims=True)           # (bb, 1)

    # Out-of-range labels correspond to an all-zero mask row in the reference:
    # only the clamp floor survives for such rows.
    in_range = jnp.logical_and(labels >= 0, labels < num_classes)
    d = jnp.where(in_range, d, jnp.float32(0.0))

    d_ref[...] = jnp.clip(d, 1e-12, 1e12)


def _round_up(n, m):
    return ((n + m - 1) // m) * m


def _default_block_b(B, C, D, x_itemsize, c_itemsize):
    # Size the batch tile against a conservative cross-generation VMEM budget
    # (v7x has 64 MiB/TC); leave room for the resident centers table.
    budget = 40 * 1024 * 1024
    centers_bytes = 2 * C * D * c_itemsize                    # worst case 2x buffered
    avail = max(budget - centers_bytes, 2 * 1024 * 1024)
    # per row: double-buffered x/labels/out tiles + one-hot + gathered intermediates
    per_row = 2 * (D * x_itemsize + 8) + C * 4 + D * 4 + 8
    bb = int(avail // per_row)
    return max(8, min(1024, (bb // 8) * 8))


def center_loss(x, centers, labels, *, block_b=None):
    """x: (B, D) float, centers: (C, D) float, labels: (B,) int.  Returns scalar loss."""
    B, D = x.shape
    C, D2 = centers.shape
    assert D == D2
    labels2d = labels.astype(jnp.int32).reshape(B, 1)

    x_itemsize = jnp.dtype(x.dtype).itemsize
    c_itemsize = jnp.dtype(centers.dtype).itemsize

    if block_b is None:
        block_b = _default_block_b(B, C, D, x_itemsize, c_itemsize)
    if B < 8:
        block_b = B                                            # single full-extent tile
    else:
        block_b = max(8, min(_round_up(block_b, 8), _round_up(B, 8)))
    nb = pl.cdiv(B, block_b)

    # Explicit scoped-VMEM limit: centers (worst-case double-buffered) + x/label/
    # output tiles (double-buffered) + one-hot/gathered intermediates + headroom.
    need = (2 * C * D * c_itemsize
            + 2 * block_b * (D * x_itemsize + 4 + 4)
            + block_b * C * 4 + block_b * D * 4)
    vmem_limit = int(min(max(int(need * 1.5), 16 * 1024 * 1024), 50 * 1024 * 1024))

    cost = pl.CostEstimate(
        flops=2 * B * C * D + 4 * B * D,
        transcendentals=0,
        bytes_accessed=B * D * x_itemsize + C * D * c_itemsize + B * 4 + B * 4,
    )

    def _build(single_buffer_centers):
        if single_buffer_centers:
            centers_spec = pl.BlockSpec((C, D), lambda i: (0, 0),
                                        pipeline_mode=pl.Buffered(1))
        else:
            centers_spec = pl.BlockSpec((C, D), lambda i: (0, 0))
        return pl.pallas_call(
            _center_loss_kernel,
            out_shape=jax.ShapeDtypeStruct((B, 1), jnp.float32),
            grid_spec=pltpu.PrefetchScalarGridSpec(
                num_scalar_prefetch=0,
                grid=(nb,),
                in_specs=[
                    pl.BlockSpec((block_b, D), lambda i: (i, 0)),   # x tile
                    pl.BlockSpec((block_b, 1), lambda i: (i, 0)),   # labels tile
                    centers_spec,                                   # resident centers
                ],
                out_specs=pl.BlockSpec((block_b, 1), lambda i: (i, 0)),
            ),
            compiler_params=pltpu.CompilerParams(
                dimension_semantics=("parallel",),
                vmem_limit_bytes=vmem_limit),
            cost_estimate=cost,
        )

    try:
        per_row = _build(True)(x, labels2d, centers)
    except Exception:
        # Fallback if the single-buffer pipeline hint is unsupported in this build.
        per_row = _build(False)(x, labels2d, centers)

    # Masked-out entries of the reference (B, C) distmat are exactly 0 and clamp to
    # 1e-12; their total contribution is B*(C-1)*1e-12, i.e. (C-1)*1e-12 after /B.
    return jnp.sum(per_row) / jnp.float32(B) + jnp.float32((C - 1) * 1e-12)


def center_loss_ref(x, centers, labels):
    """Pure-JAX reference mirroring the PyTorch module (expand + addmm + mask + clamp)."""
    B = x.shape[0]
    C = centers.shape[0]
    distmat = (
        jnp.sum(x**2, axis=1, keepdims=True)
        + jnp.sum(centers**2, axis=1, keepdims=True).T
        - 2.0 * (x @ centers.T)
    )
    mask = (labels[:, None] == jnp.arange(C)[None, :]).astype(jnp.float32)
    dist = jnp.clip(distmat * mask, 1e-12, 1e12)
    return jnp.sum(dist) / B


if __name__ == "__main__":
    key = jax.random.PRNGKey(0)

    # Test 1: module defaults (num_classes=10, feat_dim=2), single grid step.
    batch, num_classes, feat_dim = 8, 10, 2
    kx, kc, kl = jax.random.split(key, 3)
    x = jax.random.normal(kx, (batch, feat_dim), dtype=jnp.float32)
    centers = jax.random.normal(kc, (num_classes, feat_dim), dtype=jnp.float32)
    labels = jax.random.randint(kl, (batch,), 0, num_classes, dtype=jnp.int32)

    loss = center_loss(x, centers, labels)
    jax.block_until_ready(loss)
    ref = center_loss_ref(x, centers, labels)
    assert jnp.allclose(loss, ref, rtol=1e-5, atol=1e-5), (loss, ref)

    # Test 2: multiple grid steps + partial tail tile (exercises tiling + OOB rows).
    batch2, num_classes2, feat_dim2 = 37, 21, 16
    kx2, kc2, kl2 = jax.random.split(jax.random.PRNGKey(1), 3)
    x2 = jax.random.normal(kx2, (batch2, feat_dim2), dtype=jnp.float32)
    centers2 = jax.random.normal(kc2, (num_classes2, feat_dim2), dtype=jnp.float32)
    labels2 = jax.random.randint(kl2, (batch2,), 0, num_classes2, dtype=jnp.int32)

    loss2 = center_loss(x2, centers2, labels2, block_b=16)
    jax.block_until_ready(loss2)
    ref2 = center_loss_ref(x2, centers2, labels2)
    assert jnp.allclose(loss2, ref2, rtol=1e-5, atol=1e-4), (loss2, ref2)

    print("KERNEL_OK")
</pallas_src>

<mosaic_0001>
module attributes {stable_mosaic.version = 11 : i64} {
  func.func @_center_loss_kernel(%arg0: i32, %arg1: memref<8x2xf32, #tpu.memory_space<vmem>>, %arg2: memref<8x1xi32, #tpu.memory_space<vmem>>, %arg3: memref<10x2xf32, #tpu.memory_space<vmem>>, %arg4: memref<8x1xf32, #tpu.memory_space<vmem>>) attributes {dimension_semantics = [#tpu.dimension_semantics<parallel>], iteration_bounds = array<i64: 1>, scalar_prefetch = 0 : i64, scratch_operands = 0 : i64, tpu.core_type = #tpu.core_type<tc>, window_params = [{transform_indices = @transform_0, window_bounds = array<i64: 8, 2>}, {transform_indices = @transform_1, window_bounds = array<i64: 8, 1>}, {pipeline_mode = #tpu.pipeline_mode<synchronous>, transform_indices = @transform_2, window_bounds = array<i64: 10, 2>}, {transform_indices = @transform_3, window_bounds = array<i64: 8, 1>}]} {
    %c0 = arith.constant 0 : index
    %c0_0 = arith.constant 0 : index
    %0 = vector.load %arg1[%c0, %c0_0] : memref<8x2xf32, #tpu.memory_space<vmem>>, vector<8x2xf32>
    %c0_1 = arith.constant 0 : index
    %c0_2 = arith.constant 0 : index
    %1 = vector.load %arg2[%c0_1, %c0_2] : memref<8x1xi32, #tpu.memory_space<vmem>>, vector<8x1xi32>
    %c0_3 = arith.constant 0 : index
    %c0_4 = arith.constant 0 : index
    %2 = vector.load %arg3[%c0_3, %c0_4] : memref<10x2xf32, #tpu.memory_space<vmem>>, vector<10x2xf32>
    %3 = tpu.iota {dimensions = array<i32: 1>} : vector<8x10xi32>
    %4 = vector.broadcast %1 : vector<8x1xi32> to vector<8x10xi32>
    %5 = arith.cmpi eq, %4, %3 : vector<8x10xi32>
    %6 = arith.extui %5 : vector<8x10xi1> to vector<8x10xi32>
    %7 = arith.sitofp %6 : vector<8x10xi32> to vector<8x10xf32>
    %cst = arith.constant dense<0.000000e+00> : vector<8x2xf32>
    %8 = tpu.matmul %7, %2, %cst {dimension_numbers = #tpu.dot_dimension_numbers<[1], [0], [0], [1], [0, 0, 1, 1], [], []>} : vector<8x10xf32>, vector<10x2xf32>, vector<8x2xf32> -> vector<8x2xf32>
    %9 = arith.subf %0, %8 : vector<8x2xf32>
    %10 = arith.mulf %9, %9 : vector<8x2xf32>
    %cst_5 = arith.constant dense<0.000000e+00> : vector<8xf32>
    %11 = vector.multi_reduction <add>, %10, %cst_5 [1] : vector<8x2xf32> to vector<8xf32>
    %12 = vector.shape_cast %11 : vector<8xf32> to vector<8x1xf32>
    %c0_i32 = arith.constant 0 : i32
    %13 = vector.broadcast %c0_i32 : i32 to vector<8x1xi32>
    %14 = arith.cmpi sge, %1, %13 : vector<8x1xi32>
    %c10_i32 = arith.constant 10 : i32
    %15 = vector.broadcast %c10_i32 : i32 to vector<8x1xi32>
    %16 = arith.cmpi slt, %1, %15 : vector<8x1xi32>
    %17 = arith.andi %14, %16 : vector<8x1xi1>
    %cst_6 = arith.constant 0.000000e+00 : f32
    %18 = vector.broadcast %cst_6 : f32 to vector<8x1xf32>
    %19 = arith.select %17, %12, %18 : vector<8x1xi1>, vector<8x1xf32>
    %cst_7 = arith.constant 9.99999996E-13 : f32
    %cst_8 = arith.constant 9.99999995E+11 : f32
    %20 = vector.broadcast %cst_7 : f32 to vector<8x1xf32>
    %21 = arith.maximumf %20, %19 : vector<8x1xf32>
    %22 = vector.broadcast %cst_8 : f32 to vector<8x1xf32>
    %23 = arith.minimumf %22, %21 : vector<8x1xf32>
    %c0_9 = arith.constant 0 : index
    %c0_10 = arith.constant 0 : index
    %24 = vector.load %arg4[%c0_9, %c0_10] : memref<8x1xf32, #tpu.memory_space<vmem>>, vector<8x1xf32>
    tpu.vector_store %arg4[%c0_9, %c0_10], %23 {strides = array<i32>} : memref<8x1xf32, #tpu.memory_space<vmem>>, vector<8x1xf32>,
    return
  }
  func.func @transform_0(%arg0: i32) -> (i32, i32) {
    %c0_i32 = arith.constant 0 : i32
    %c0_i32_0 = arith.constant 0 : i32
    return %arg0, %c0_i32 : i32, i32
  }
  func.func @transform_1(%arg0: i32) -> (i32, i32) {
    %c0_i32 = arith.constant 0 : i32
    %c0_i32_0 = arith.constant 0 : i32
    return %arg0, %c0_i32 : i32, i32
  }
  func.func @transform_2(%arg0: i32) -> (i32, i32) {
    %c0_i32 = arith.constant 0 : i32
    %c0_i32_0 = arith.constant 0 : i32
    %c0_i32_1 = arith.constant 0 : i32
    return %c0_i32, %c0_i32_0 : i32, i32
  }
  func.func @transform_3(%arg0: i32) -> (i32, i32) {
    %c0_i32 = arith.constant 0 : i32
    %c0_i32_0 = arith.constant 0 : i32
    return %arg0, %c0_i32 : i32, i32
  }
}

module attributes {stable_mosaic.version = 11 : i64} {
  func.func @_center_loss_kernel(%arg0: i32, %arg1: memref<8x2xf32, #tpu.memory_space<vmem>>, %arg2: memref<8x1xi32, #tpu.memory_space<vmem>>, %arg3: memref<10x2xf32, #tpu.memory_space<vmem>>, %arg4: memref<8x1xf32, #tpu.memory_space<vmem>>) attributes {dimension_semantics = [#tpu.dimension_semantics<parallel>], iteration_bounds = array<i64: 1>, scalar_prefetch = 0 : i64, scratch_operands = 0 : i64, tpu.core_type = #tpu.core_type<tc>, window_params = [{transform_indices = @transform_0, window_bounds = array<i64: 8, 2>}, {transform_indices = @transform_1, window_bounds = array<i64: 8, 1>}, {pipeline_mode = #tpu.pipeline_mode<synchronous>, transform_indices = @transform_2, window_bounds = array<i64: 10, 2>}, {transform_indices = @transform_3, window_bounds = array<i64: 8, 1>}]} {
    %c0 = arith.constant 0 : index
    %c0_0 = arith.constant 0 : index
    %0 = vector.load %arg1[%c0, %c0_0] : memref<8x2xf32, #tpu.memory_space<vmem>>, vector<8x2xf32>
    %c0_1 = arith.constant 0 : index
    %c0_2 = arith.constant 0 : index
    %1 = vector.load %arg2[%c0_1, %c0_2] : memref<8x1xi32, #tpu.memory_space<vmem>>, vector<8x1xi32>
    %c0_3 = arith.constant 0 : index
    %c0_4 = arith.constant 0 : index
    %2 = vector.load %arg3[%c0_3, %c0_4] : memref<10x2xf32, #tpu.memory_space<vmem>>, vector<10x2xf32>
    %3 = tpu.iota {dimensions = array<i32: 1>} : vector<8x10xi32>
    %4 = vector.broadcast %1 : vector<8x1xi32> to vector<8x10xi32>
    %5 = arith.cmpi eq, %4, %3 : vector<8x10xi32>
    %6 = arith.extui %5 : vector<8x10xi1> to vector<8x10xi32>
    %7 = arith.sitofp %6 : vector<8x10xi32> to vector<8x10xf32>
    %cst = arith.constant dense<0.000000e+00> : vector<8x2xf32>
    %8 = tpu.matmul %7, %2, %cst {dimension_numbers = #tpu.dot_dimension_numbers<[1], [0], [0], [1], [0, 0, 1, 1], [], []>} : vector<8x10xf32>, vector<10x2xf32>, vector<8x2xf32> -> vector<8x2xf32>
    %9 = arith.subf %0, %8 : vector<8x2xf32>
    %10 = arith.mulf %9, %9 : vector<8x2xf32>
    %cst_5 = arith.constant dense<0.000000e+00> : vector<8xf32>
    %11 = vector.multi_reduction <add>, %10, %cst_5 [1] : vector<8x2xf32> to vector<8xf32>
    %12 = vector.shape_cast %11 : vector<8xf32> to vector<8x1xf32>
    %c0_i32 = arith.constant 0 : i32
    %13 = vector.broadcast %c0_i32 : i32 to vector<8x1xi32>
    %14 = arith.cmpi sge, %1, %13 : vector<8x1xi32>
    %c10_i32 = arith.constant 10 : i32
    %15 = vector.broadcast %c10_i32 : i32 to vector<8x1xi32>
    %16 = arith.cmpi slt, %1, %15 : vector<8x1xi32>
    %17 = arith.andi %14, %16 : vector<8x1xi1>
    %cst_6 = arith.constant 0.000000e+00 : f32
    %18 = vector.broadcast %cst_6 : f32 to vector<8x1xf32>
    %19 = arith.select %17, %12, %18 : vector<8x1xi1>, vector<8x1xf32>
    %cst_7 = arith.constant 9.99999996E-13 : f32
    %cst_8 = arith.constant 9.99999995E+11 : f32
    %20 = vector.broadcast %cst_7 : f32 to vector<8x1xf32>
    %21 = arith.maximumf %20, %19 : vector<8x1xf32>
    %22 = vector.broadcast %cst_8 : f32 to vector<8x1xf32>
    %23 = arith.minimumf %22, %21 : vector<8x1xf32>
    %c0_9 = arith.constant 0 : index
    %c0_10 = arith.constant 0 : index
    %24 = vector.load %arg4[%c0_9, %c0_10] : memref<8x1xf32, #tpu.memory_space<vmem>>, vector<8x1xf32>
    tpu.vector_store %arg4[%c0_9, %c0_10], %23 {strides = array<i32>} : memref<8x1xf32, #tpu.memory_space<vmem>>, vector<8x1xf32>,
    return
  }
  func.func @transform_0(%arg0: i32) -> (i32, i32) {
    %c0_i32 = arith.constant 0 : i32
    %c0_i32_0 = arith.constant 0 : i32
    return %arg0, %c0_i32 : i32, i32
  }
  func.func @transform_1(%arg0: i32) -> (i32, i32) {
    %c0_i32 = arith.constant 0 : i32
    %c0_i32_0 = arith.constant 0 : i32
    return %arg0, %c0_i32 : i32, i32
  }
  func.func @transform_2(%arg0: i32) -> (i32, i32) {
    %c0_i32 = arith.constant 0 : i32
    %c0_i32_0 = arith.constant 0 : i32
    %c0_i32_1 = arith.constant 0 : i32
    return %c0_i32, %c0_i32_0 : i32, i32
  }
  func.func @transform_3(%arg0: i32) -> (i32, i32) {
    %c0_i32 = arith.constant 0 : i32
    %c0_i32_0 = arith.constant 0 : i32
    return %arg0, %c0_i32 : i32, i32
  }
}

</mosaic_0001>

<bundles_post_ra>
// kernel: tpu_custom_call.1
= control target key start
LH: loop header
LB: loop body
LE: loop exit
PB: predicated region body
PF: predicated region fallthrough
CT: control target
= control target key end

     0   :  { %vm30_vm0 = vcmask 1041408   ;;  %v78_v0 = vmov 0   ;;  %v18_v4 = vlaneseq  ;;  %vm26_vm1 = vcmask 80896   ;;  %s115_s1 = inlined_call_operand.vmem [shape: s32[8,1], index: 1, kind: input, shape index: {}]   ;;  %s116_s2 = inlined_call_operand.vmem [shape: f32[10,2], index: 2, kind: input, shape index: {}]   ;;  %s117_s0 = inlined_call_operand.vmem [shape: f32[8,2], index: 0, kind: input, shape index: {}]   ;;  %s118_s3 = inlined_call_operand.vmem [shape: f32[8,1], index: 3, kind: output, shape index: {}]  }
   0x1   :  { %77 = vset.pattern.permute.xlu0 %v78_v0  ;;  %v15_v1 = vld [vmem:[%s115_s1] sm:$0xff]  ;;  %v17_v2 = vld [vmem:[%s116_s2 + $0x8] sm:$0x3]  ;;  %v79_v7 = vmov 0.0   ;;  %vm56_vm3 = vcmask 15360   ;;  %vm66_vm7 = vcmask 7168  }
   0x2   :  { %21 = vperm.xlu0 %77, %v15_v1   ;;  %73 = vmatpush.msk.msra.mxu0 %vm30_vm0, %v17_v2  ;;  %v16_v3 = vld [vmem:[%s116_s2] sm:$0xff]  ;;  %v19_v5 = vand.u32 127, %v18_v4  ;;  %vm60_vm4 = vcmp.ge.s32.totalorder %v15_v1, 0  ;;  %vm61_vm5 = vcmp.lt.s32.totalorder %v15_v1, 10 }
   0x3   :  { %v14_v9 = vld [vmem:[%s117_s0] sm:$0xff]  ;;  %vm62_vm6 = vmand %vm60_vm4, %vm61_vm5 }
   0x4   :  { %49 = vmatpush.msra.mxu0 %v16_v3 }
  0x74   :  { %v22_v6 = vpop.permute.xlu0 %21 }
  0x75   :  { %vm23_vm2 = vcmp.eq.s32.totalorder %v22_v6, %v19_v5 }
  0x76   :  { %v72_v8 = vsel %vm23_vm2, 1.0, %v79_v7 }
  0x77   :  { %74 = vmatmul.msk.f32.vlgmr.msra.gmra.mxu0 %vm26_vm1, %v72_v8 }
  0xf4   :  { %v51_v10 = vpop.f32.mrf.mxu0 }
  0xf5   :  { %v54_v11 = vsub.f32 %v14_v9, %v51_v10 }
  0xf7   :  { %v55_v12 = vmul.f32 %v54_v11, %v54_v11 }
  0xf9   :  { %v57_v13 = vsel %vm56_vm3, %v55_v12, 0.0 }
  0xfa   :  { %58 = vadd.xlane.f32.xlu0 %v57_v13 }
 0x16d   :  { %v59_v14 = vpop.xlane.xlu0 %58 }
 0x16e   :  { %v63_v15 = vsel %vm62_vm6, %v59_v14, 0.0 }
 0x16f   :  { %v64_v16 = vmax.f32 %v63_v15, 1e-12 }
 0x171   :  { %v65_v17 = vmin.f32 %v64_v16, 1e+12 }
 0x173   :  { %67 = vst.msk [vmem:[%s118_s3] sm:$0xff] %vm66_vm7, %v65_v17 }

// kernel: tpu_custom_call.1
= control target key start
LH: loop header
LB: loop body
LE: loop exit
PB: predicated region body
PF: predicated region fallthrough
CT: control target
= control target key end

     0   :  { %vm30_vm0 = vcmask 1041408   ;;  %v78_v0 = vmov 0   ;;  %v18_v4 = vlaneseq  ;;  %vm26_vm1 = vcmask 80896   ;;  %s115_s1 = inlined_call_operand.vmem [shape: s32[8,1], index: 1, kind: input, shape index: {}]   ;;  %s116_s2 = inlined_call_operand.vmem [shape: f32[10,2], index: 2, kind: input, shape index: {}]   ;;  %s117_s0 = inlined_call_operand.vmem [shape: f32[8,2], index: 0, kind: input, shape index: {}]   ;;  %s118_s3 = inlined_call_operand.vmem [shape: f32[8,1], index: 3, kind: output, shape index: {}]  }
   0x1   :  { %77 = vset.pattern.permute.xlu0 %v78_v0  ;;  %v15_v1 = vld [vmem:[%s115_s1] sm:$0xff]  ;;  %v17_v2 = vld [vmem:[%s116_s2 + $0x8] sm:$0x3]  ;;  %v79_v7 = vmov 0.0   ;;  %vm56_vm3 = vcmask 15360   ;;  %vm66_vm7 = vcmask 7168  }
   0x2   :  { %21 = vperm.xlu0 %77, %v15_v1   ;;  %73 = vmatpush.msk.msra.mxu0 %vm30_vm0, %v17_v2  ;;  %v16_v3 = vld [vmem:[%s116_s2] sm:$0xff]  ;;  %v19_v5 = vand.u32 127, %v18_v4  ;;  %vm60_vm4 = vcmp.ge.s32.totalorder %v15_v1, 0  ;;  %vm61_vm5 = vcmp.lt.s32.totalorder %v15_v1, 10 }
   0x3   :  { %v14_v9 = vld [vmem:[%s117_s0] sm:$0xff]  ;;  %vm62_vm6 = vmand %vm60_vm4, %vm61_vm5 }
   0x4   :  { %49 = vmatpush.msra.mxu0 %v16_v3 }
  0x74   :  { %v22_v6 = vpop.permute.xlu0 %21 }
  0x75   :  { %vm23_vm2 = vcmp.eq.s32.totalorder %v22_v6, %v19_v5 }
  0x76   :  { %v72_v8 = vsel %vm23_vm2, 1.0, %v79_v7 }
  0x77   :  { %74 = vmatmul.msk.f32.vlgmr.msra.gmra.mxu0 %vm26_vm1, %v72_v8 }
  0xf4   :  { %v51_v10 = vpop.f32.mrf.mxu0 }
  0xf5   :  { %v54_v11 = vsub.f32 %v14_v9, %v51_v10 }
  0xf7   :  { %v55_v12 = vmul.f32 %v54_v11, %v54_v11 }
  0xf9   :  { %v57_v13 = vsel %vm56_vm3, %v55_v12, 0.0 }
  0xfa   :  { %58 = vadd.xlane.f32.xlu0 %v57_v13 }
 0x16d   :  { %v59_v14 = vpop.xlane.xlu0 %58 }
 0x16e   :  { %v63_v15 = vsel %vm62_vm6, %v59_v14, 0.0 }
 0x16f   :  { %v64_v16 = vmax.f32 %v63_v15, 1e-12 }
 0x171   :  { %v65_v17 = vmin.f32 %v64_v16, 1e+12 }
 0x173   :  { %67 = vst.msk [vmem:[%s118_s3] sm:$0xff] %vm66_vm7, %v65_v17 }

</bundles_post_ra>
